<compile_context>
chip_gen: v5e
topology: v5e:2x2
jax: 0.10.0
libtpu: 0.0.40
codegen_flags: <defaults>
</compile_context>

<pallas_src>
import jax
import jax.numpy as jnp
from jax.experimental import pallas as pl
from jax.experimental.pallas import tpu as pltpu


def a2c_kernel(x_ref, w_ref, out_ref):
    # Single fused matmul: actor logits (already /beta via host fold) in lanes
    # [:A], critic value in lane A.
    y = jnp.dot(x_ref[...], w_ref[...], preferred_element_type=jnp.float32)  # (1, A+1)

    num_actions = out_ref.shape[-1] - 1
    lane = jax.lax.broadcasted_iota(jnp.int32, y.shape, 1)
    is_actor = lane < num_actions

    # Numerically-stable softmax over the actor lanes only (critic lane masked).
    z = jnp.where(is_actor, y, -jnp.inf)
    z = z - jnp.max(z, axis=-1, keepdims=True)
    e = jnp.where(is_actor, jnp.exp(z), 0.0)
    denom = jnp.sum(e, axis=-1, keepdims=True)
    pi = e * pl.reciprocal(denom, approx=False)   # exact: keeps 1e-5 tolerance

    # Packed output: pi in actor lanes, raw value estimate in the last lane.
    out_ref[...] = jnp.where(is_actor, pi, y)


def pack_params(w_a, b_a, w_c, b_c):
    """One-time fusion of the two heads + bias fold.

    Weights are stored pre-transposed as (in, out).  Returns the augmented
    matrix W_aug of shape (dim_input + 1, dim_output + 1):
        rows 0..D-1 : [W_actor | W_critic]
        row  D      : [b_actor | b_critic]
    """
    w_heads = jnp.concatenate([w_a, w_c], axis=1)                 # (D, A+1)
    b_heads = jnp.concatenate([b_a, b_c], axis=0)[None, :]        # (1, A+1)
    return jnp.concatenate([w_heads, b_heads], axis=0)            # (D+1, A+1)


def a2c_forward(x, w_packed, beta=1.0):
    """Returns (pi, v) matching torch A2C_linear.forward: pi is (dim_output,), v is (1,)."""
    assert beta > 0
    d_aug, a_aug = w_packed.shape
    dim_output = a_aug - 1

    # Fold softmax temperature into the actor columns (host-side, outside kernel).
    inv_beta = jnp.float32(1.0 / beta)
    col_scale = jnp.concatenate(
        [jnp.full((dim_output,), inv_beta, jnp.float32),
         jnp.ones((1,), jnp.float32)])
    w_call = (w_packed.astype(jnp.float32) * col_scale)           # (D+1, A+1)

    # Append the constant-1 lane that realizes the bias fold.
    x_aug = jnp.concatenate(
        [x.astype(jnp.float32), jnp.ones((1,), jnp.float32)]).reshape(1, d_aug)

    vmem = pl.BlockSpec(memory_space=pltpu.MemorySpace.VMEM)
    packed = pl.pallas_call(
        a2c_kernel,
        out_shape=jax.ShapeDtypeStruct((1, a_aug), jnp.float32),
        in_specs=[vmem, vmem],
        out_specs=vmem,
    )(x_aug, w_call)

    pi = packed[0, :dim_output]
    v = packed[0, dim_output:]
    return pi, v


def init_params(key, dim_input, dim_output):
    """Mirror torch.nn.Linear default init: U(-1/sqrt(fan_in), +1/sqrt(fan_in)).
    Weights are stored pre-transposed as (in, out)."""
    def linear(k, fan_in, fan_out):
        kw, kb = jax.random.split(k)
        bound = 1.0 / jnp.sqrt(jnp.float32(fan_in))
        w = jax.random.uniform(kw, (fan_in, fan_out), jnp.float32, -bound, bound)
        b = jax.random.uniform(kb, (fan_out,), jnp.float32, -bound, bound)
        return w, b

    k1, k2 = jax.random.split(key)
    w_a, b_a = linear(k1, dim_input, dim_output)
    w_c, b_c = linear(k2, dim_input, 1)
    return w_a, b_a, w_c, b_c


def a2c_reference(x, w_a, b_a, w_c, b_c, beta=1.0):
    """Pure-JAX mirror of the torch forward, for the correctness check."""
    logits = x @ w_a + b_a
    pi = jax.nn.softmax(logits / beta, axis=0)
    v = x @ w_c + b_c
    return pi, v


if __name__ == "__main__":
    dim_input, dim_output = 16, 8
    beta = 0.7  # exercise the beta fold path (same math as beta=1)

    key = jax.random.PRNGKey(0)
    k_params, k_x = jax.random.split(key)
    w_a, b_a, w_c, b_c = init_params(k_params, dim_input, dim_output)
    x = jax.random.normal(k_x, (dim_input,), jnp.float32)

    w_packed = pack_params(w_a, b_a, w_c, b_c)     # one-time head fusion + bias fold

    pi, v = a2c_forward(x, w_packed, beta=beta)
    pi, v = jax.block_until_ready((pi, v))

    pi_ref, v_ref = a2c_reference(x, w_a, b_a, w_c, b_c, beta=beta)
    assert pi.shape == (dim_output,) and v.shape == (1,)
    assert jnp.allclose(pi, pi_ref, atol=1e-5, rtol=1e-5)
    assert jnp.allclose(v, v_ref, atol=1e-5, rtol=1e-5)
    assert jnp.allclose(jnp.sum(pi), 1.0, atol=1e-5)

    print("KERNEL_OK")
</pallas_src>

<mosaic_0001>
module attributes {stable_mosaic.version = 11 : i64} {
  func.func @a2c_kernel(%arg0: memref<1x17xf32, #tpu.memory_space<vmem>>, %arg1: memref<17x9xf32, #tpu.memory_space<vmem>>, %arg2: memref<1x9xf32, #tpu.memory_space<vmem>>) attributes {dimension_semantics = [], scalar_prefetch = 0 : i64, scratch_operands = 0 : i64, tpu.core_type = #tpu.core_type<tc>} {
    %c0 = arith.constant 0 : index
    %c0_0 = arith.constant 0 : index
    %0 = vector.load %arg0[%c0, %c0_0] : memref<1x17xf32, #tpu.memory_space<vmem>>, vector<1x17xf32>
    %c0_1 = arith.constant 0 : index
    %c0_2 = arith.constant 0 : index
    %1 = vector.load %arg1[%c0_1, %c0_2] : memref<17x9xf32, #tpu.memory_space<vmem>>, vector<17x9xf32>
    %cst = arith.constant dense<0.000000e+00> : vector<1x9xf32>
    %2 = tpu.matmul %0, %1, %cst {dimension_numbers = #tpu.dot_dimension_numbers<[1], [0], [0], [1], [0, 0, 1, 1], [], []>} : vector<1x17xf32>, vector<17x9xf32>, vector<1x9xf32> -> vector<1x9xf32>
    %3 = tpu.iota {dimensions = array<i32: 1>} : vector<1x9xi32>
    %c8_i32 = arith.constant 8 : i32
    %4 = vector.broadcast %c8_i32 : i32 to vector<1x9xi32>
    %5 = arith.cmpi slt, %3, %4 : vector<1x9xi32>
    %cst_3 = arith.constant 0xFF800000 : f32
    %6 = vector.broadcast %cst_3 : f32 to vector<1x9xf32>
    %7 = arith.select %5, %2, %6 : vector<1x9xi1>, vector<1x9xf32>
    %cst_4 = arith.constant dense<0xFF800000> : vector<1xf32>
    %8 = vector.multi_reduction <maximumf>, %7, %cst_4 [1] : vector<1x9xf32> to vector<1xf32>
    %9 = vector.shape_cast %8 : vector<1xf32> to vector<1x1xf32>
    %10 = vector.broadcast %9 : vector<1x1xf32> to vector<1x9xf32>
    %11 = arith.subf %7, %10 : vector<1x9xf32>
    %12 = math.exp %11 : vector<1x9xf32>
    %cst_5 = arith.constant 0.000000e+00 : f32
    %13 = vector.broadcast %cst_5 : f32 to vector<1x9xf32>
    %14 = arith.select %5, %12, %13 : vector<1x9xi1>, vector<1x9xf32>
    %cst_6 = arith.constant dense<0.000000e+00> : vector<1xf32>
    %15 = vector.multi_reduction <add>, %14, %cst_6 [1] : vector<1x9xf32> to vector<1xf32>
    %16 = vector.shape_cast %15 : vector<1xf32> to vector<1x1xf32>
    %17 = tpu.reciprocal %16 : vector<1x1xf32> -> vector<1x1xf32>
    %18 = vector.broadcast %17 : vector<1x1xf32> to vector<1x9xf32>
    %19 = arith.mulf %14, %18 : vector<1x9xf32>
    %20 = arith.select %5, %19, %2 : vector<1x9xi1>, vector<1x9xf32>
    %c0_7 = arith.constant 0 : index
    %c0_8 = arith.constant 0 : index
    %21 = vector.load %arg2[%c0_7, %c0_8] : memref<1x9xf32, #tpu.memory_space<vmem>>, vector<1x9xf32>
    tpu.vector_store %arg2[%c0_7, %c0_8], %20 {strides = array<i32>} : memref<1x9xf32, #tpu.memory_space<vmem>>, vector<1x9xf32>,
    return
  }
}

</mosaic_0001>

<bundles_post_ra>
// kernel: tpu_custom_call.1
= control target key start
LH: loop header
LB: loop body
LE: loop exit
PB: predicated region body
PF: predicated region fallthrough
CT: control target
= control target key end

     0   :  { %vm20_vm0 = vcmask 1040384   ;;  %s162_s0 = inlined_call_operand.vmem [shape: f32[1,17], index: 0, kind: input, shape index: {}]   ;;  %s163_s1 = inlined_call_operand.vmem [shape: f32[17,9], index: 1, kind: input, shape index: {}]   ;;  %s164_s2 = inlined_call_operand.hbm [shape: f32[1,9], index: 2, kind: output, shape index: {}]  }
   0x1   :  { %v15_v0 = vld [vmem:[%s163_s1 + $0x10] sm:$0x1]  ;;  %v14_v1 = vld [vmem:[%s163_s1 + $0x8] sm:$0xff] }
   0x2   :  { %92 = vmatpush.msk.msra.mxu0 %vm20_vm0, %v15_v0 }
   0x3   :  { %7 = vsyncpa [#allocation3], 0  ;;  %v13_v2 = vld [vmem:[%s163_s1] sm:$0xff]  ;;  %vm16_vm1 = vcmask 138240   ;;  %v44_v4 = vlaneseq  ;;  %vm48_vm3 = vcmask 65536   ;;  %s83_s19 = sshll.u32 %s164_s2, 4  ;;  %s84_s19 = int_to_ptr.hbm [resolvable:$true] %s83_s19 }
   0x4   :  { %38 = vmatpush.msra.mxu0 %v14_v1  ;;  %v12_v3 = vld [vmem:[%s162_s0] sm:$0x1]  ;;  %s125_s0 = smov [#allocation2]  }
   0x5   :  { %v45_v5 = vand.u32 127, %v44_v4  ;;  %s81_s1 = sshll.u32 %s125_s0, 4  ;;  %s82_s1 = int_to_ptr.vmem [resolvable:$true] %s81_s1 }
   0x6   :  { %39 = vmatpush.msra.mxu0 %v13_v2 }
   0x7   :  { %93 = vmatmul.msk.f32.vlgmr.msra.gmra.mxu0 %vm16_vm1, %v12_v3  ;;  %vm46_vm2 = vcmp.lt.s32.totalorder %v45_v5, 8 }
  0x84   :  { %v41_v6 = vpop.f32.mrf.mxu0 }
  0x85   :  { %v47_v7 = vsel %vm46_vm2, %v41_v6, -inf }
  0x86   :  { %v49_v8 = vsel %vm48_vm3, %v47_v7, -inf }
  0x87   :  { %50 = vmax.xlane.f32.xlu0 %v49_v8 }
  0xfa   :  { %v51_v9 = vpop.xlane.xlu0 %50 }
  0xfb   :  { %v52_v10 = vsub.f32 %v47_v7, %v51_v9 }
  0xfd   :  { %v53_v11 = vmul.f32 1.442695, %v52_v10 }
  0xff   :  { %95 = vpow2.f32 %v53_v11 }
 0x105   :  { %v96_v12 = vpop.eup %95 }
 0x106   :  { %v55_v13 = vsel %vm46_vm2, %v96_v12, 0.0 }
 0x107   :  { %v56_v14 = vsel %vm48_vm3, %v55_v13, 0.0 }
 0x108   :  { %57 = vadd.xlane.f32.xlu0 %v56_v14 }
 0x17b   :  { %v58_v15 = vpop.xlane.xlu0 %57 }
 0x17c   :  { %97 = vrcp.f32 %v58_v15  ;;  %v70_v19 = vand.u32 2147483648, %v58_v15  ;;  %v68_v21 = vand.u32 2147483647, %v58_v15  ;;  %vm64_vm5 = vweird.f32 %v58_v15 }
 0x17e   :  { %v71_v23 = vor.u32 1.1754944e-38, %v70_v19  ;;  %vm69_vm7 = vcmp.eq.f32.partialorder %v68_v21, 8.507059e+37 }
 0x182   :  { %v98_v16 = vpop.eup %97 }
 0x183   :  { %v60_v17 = vmul.f32 %v98_v16, %v58_v15  ;;  %vm65_vm4 = vweird.f32 %v98_v16 }
 0x184   :  { %vm66_vm6 = vmor %vm64_vm5, %vm65_vm4 }
 0x185   :  { %v61_v18 = vsub.f32 1.0, %v60_v17 }
 0x187   :  { %v62_v20 = vmul.f32 %v98_v16, %v61_v18 }
 0x189   :  { %v63_v22 = vadd.f32 %v98_v16, %v62_v20 }
 0x18b   :  { %v67_v24 = vsel %vm66_vm6, %v98_v16, %v63_v22 }
 0x18c   :  { %v72_v25 = vsel %vm69_vm7, %v71_v23, %v67_v24 }
 0x18d   :  { %v73_v26 = vmul.f32 %v72_v25, %v55_v13 }
 0x18f   :  { %v74_v27 = vsel %vm46_vm2, %v73_v26, %v41_v6 }
 0x190   :  { %75 = vst.msk [vmem:[#allocation2] sm:$0x1] %vm48_vm3, %v74_v27 }
 0x191   :  { %86 = dma.vmem_to_hbm [thread:$0]  %s82_s1, 16, %s84_s19, [#allocation3]  }
 0x192   :  { %123 = dma.done.wait [#allocation3], 16  }
 0x193   :  { %124 = vsyncadd [#allocation3], 4294967280 }
 0x194   :  { %91 = vsyncpa [#allocation3], 1 }

</bundles_post_ra>
